<compile_context>
chip_gen: v7x
topology: tpu7x:2x2x1
jax: 0.10.0
libtpu: 0.0.40
codegen_flags: <defaults>
</compile_context>

<pallas_src>
import functools
import math

import jax
import jax.numpy as jnp
from jax.experimental import pallas as pl
from jax.experimental.pallas import tpu as pltpu


def _power_constraint_kernel(x_ref, o_ref, *, const_scale):
    """One (TB, N) batch tile: per-row L2 normalization + constant rescale."""
    # Reduction in f32 regardless of input dtype (bf16/fp16 precision safety).
    x_f32 = x_ref[...].astype(jnp.float32)
    ssq = jnp.sum(x_f32 * x_f32, axis=1, keepdims=True)          # (TB, 1)
    # scale = sqrt(0.5*P) * sqrt(N) / sqrt(ssq); rsqrt goes to the EUP slot.
    scale = const_scale * jax.lax.rsqrt(ssq)                     # (TB, 1), f32
    # Re-read the ref (cheap vld, kernel is HBM-bound) rather than holding the
    # whole tile live in vregs across the reduction; single lane-dense store.
    # TODO(synk): if an xprof trace shows exposed input DMA from this two-pass
    # body, sweep pipeline_mode=pl.Buffered(3) on the input BlockSpec.
    o_ref[...] = (x_ref[...].astype(jnp.float32) * scale).astype(o_ref.dtype)


def _choose_batch_tile(B, N, itemsize, *, target_block_bytes=4 << 20,
                       min_grid_steps=4):
    """Rows per block.

    Budgeted by the f32 working set (sub-32-bit inputs are widened in-kernel),
    capped so the grid has >= min_grid_steps blocks (v7x dual-TC sharding +
    pipeline depth per core), multiple of 8 sublanes (or the full batch), and
    preferring a tile that divides B exactly to avoid a ragged final block.
    """
    eff_itemsize = max(int(itemsize), 4)      # account for in-kernel f32 widening
    rows_by_bytes = max(1, target_block_bytes // max(1, N * eff_itemsize))
    rows_by_grid = max(1, -(-B // min_grid_steps))       # cdiv(B, min_grid_steps)
    rows = min(rows_by_bytes, rows_by_grid, B)
    if rows >= B:
        return B                               # whole batch in one block (full dim legal)
    rows = max(8, (rows // 8) * 8)             # keep (8,128) sublane alignment
    if rows >= B:
        return B
    # Prefer a TB that divides B exactly (no wasted DMA/compute on the last block).
    for tb in range(rows, 7, -8):
        if B % tb == 0:
            return tb
    # TODO(synk): if a single 8-row block ever exceeds VMEM (enormous N), switch
    # to a two-phase grid over N (ssq accumulate w/ pl.when init, then rescale).
    return rows


def _vmem_limit_bytes(tb, N, itemsize):
    """2x(in)+2x(out) double buffers + widened f32 temp + headroom, capped for v7x."""
    blk = tb * N * int(itemsize)
    f32_work = tb * N * 4
    limit = 4 * blk + f32_work + (4 << 20)
    return int(min(max(limit, 16 << 20), 48 << 20))


def complex_average_power_constraint(hids, average_power, *, use_pallas=None,
                                     donate_input=False):
    """JAX/Pallas equivalent of ComplexAveragePowerConstraint.forward.

    donate_input=True aliases the input buffer into the output
    (input_output_aliases); only set it if the caller donates `hids`.
    """
    orig_shape = hids.shape
    B = int(orig_shape[0])
    N = int(math.prod(orig_shape[1:]))
    itemsize = jnp.dtype(hids.dtype).itemsize

    # power_avg_factor * sqrt(prod(shape[1:])) is a static scalar -> bake it in.
    const_scale = math.sqrt(0.5 * float(average_power)) * math.sqrt(float(N))

    lane_aligned = (N % 128 == 0)
    if use_pallas is None:
        # Tiny activations: plain XLA fusion is as fast as a kernel launch.
        # Non-128-aligned N would force masked partial stores -> not worth it.
        use_pallas = lane_aligned and (B * N * itemsize >= (1 << 20))
    if not use_pallas:
        return _reference(hids, average_power)

    x2d = hids.reshape(B, N)
    tb = _choose_batch_tile(B, N, itemsize)
    grid = (pl.cdiv(B, tb),)

    kernel = functools.partial(_power_constraint_kernel, const_scale=const_scale)

    out2d = pl.pallas_call(
        kernel,
        out_shape=jax.ShapeDtypeStruct((B, N), x2d.dtype),
        grid=grid,
        in_specs=[pl.BlockSpec((tb, N), lambda i: (i, 0))],
        out_specs=pl.BlockSpec((tb, N), lambda i: (i, 0)),
        input_output_aliases=({0: 0} if donate_input else {}),
        cost_estimate=pl.CostEstimate(
            flops=3 * B * N,
            transcendentals=B,
            bytes_accessed=2 * B * N * itemsize,
        ),
        compiler_params=pltpu.CompilerParams(
            dimension_semantics=("parallel",),
            vmem_limit_bytes=_vmem_limit_bytes(tb, N, itemsize),
        ),
    )(x2d)

    return out2d.reshape(orig_shape)


def _reference(hids, average_power):
    # Pure-JAX reference mirroring the PyTorch code (f32 accumulation).
    shape = hids.shape
    n = float(math.prod(shape[1:]))
    axes = tuple(range(1, len(shape)))
    x = hids.astype(jnp.float32)
    denom = jnp.sqrt(jnp.sum(x * x, axis=axes, keepdims=True))
    scale = math.sqrt(0.5 * float(average_power)) * math.sqrt(n)
    return (scale * x / denom).astype(hids.dtype)


if __name__ == "__main__":
    average_power = 1.0  # module hyperparameter (deterministic, set in-script)
    key = jax.random.PRNGKey(0)
    k1, k2, k3 = jax.random.split(key, 3)

    # 1) Small NCHW feature map consistent with the module's intended use.
    B, C, H, W = 2, 4, 16, 16                       # N = 1024 (128-aligned)
    x = jax.random.normal(k1, (B, C, H, W), dtype=jnp.float32)
    ref = _reference(x, average_power)
    out = jax.block_until_ready(
        complex_average_power_constraint(x, average_power, use_pallas=True)
    )
    assert out.shape == (B, C, H, W) and out.dtype == jnp.float32
    assert jnp.allclose(out, ref, atol=1e-5, rtol=1e-5), "mismatch vs reference (small)"

    # 2) Moderate batch exercising the multi-block pipelined path.
    #    B=200, N=8192 -> TB=40 (divides B exactly), grid=5 (>=4 steps for v7x).
    B2, C2, H2, W2 = 200, 8, 32, 32
    x2 = jax.random.normal(k2, (B2, C2, H2, W2), dtype=jnp.float32)
    ref2 = _reference(x2, average_power)
    out2 = jax.block_until_ready(
        complex_average_power_constraint(x2, average_power, use_pallas=True)
    )
    assert out2.shape == (B2, C2, H2, W2) and out2.dtype == jnp.float32
    assert jnp.allclose(out2, ref2, atol=1e-4, rtol=1e-4), "mismatch vs reference (tiled)"

    # 3) bf16 input: f32 in-kernel accumulation, VMEM budgeted for the widened temp.
    B3, C3, H3, W3 = 64, 8, 16, 16                  # N = 2048 (128-aligned)
    x3 = jax.random.normal(k3, (B3, C3, H3, W3), dtype=jnp.bfloat16)
    ref3 = _reference(x3, average_power)
    out3 = jax.block_until_ready(
        complex_average_power_constraint(x3, average_power, use_pallas=True)
    )
    assert out3.shape == (B3, C3, H3, W3) and out3.dtype == jnp.bfloat16
    assert jnp.allclose(out3.astype(jnp.float32), ref3.astype(jnp.float32),
                        atol=2e-2, rtol=2e-2), "mismatch vs reference (bf16)"

    print("KERNEL_OK")
</pallas_src>

<mosaic_0001>
module attributes {stable_mosaic.version = 11 : i64} {
  func.func @_power_constraint_kernel(%arg0: i32, %arg1: memref<2x1024xf32, #tpu.memory_space<vmem>>, %arg2: memref<2x1024xf32, #tpu.memory_space<vmem>>) attributes {dimension_semantics = [#tpu.dimension_semantics<parallel>], iteration_bounds = array<i64: 1>, scalar_prefetch = 0 : i64, scratch_operands = 0 : i64, tpu.core_type = #tpu.core_type<tc>, window_params = [{transform_indices = @transform_0, window_bounds = array<i64: 2, 1024>}, {transform_indices = @transform_1, window_bounds = array<i64: 2, 1024>}]} {
    %c0 = arith.constant 0 : index
    %c0_0 = arith.constant 0 : index
    %0 = vector.load %arg1[%c0, %c0_0] : memref<2x1024xf32, #tpu.memory_space<vmem>>, vector<2x1024xf32>
    %1 = arith.mulf %0, %0 : vector<2x1024xf32>
    %cst = arith.constant dense<0.000000e+00> : vector<2xf32>
    %2 = vector.multi_reduction <add>, %1, %cst [1] : vector<2x1024xf32> to vector<2xf32>
    %3 = vector.shape_cast %2 : vector<2xf32> to vector<2x1xf32>
    %4 = math.rsqrt %3 : vector<2x1xf32>
    %cst_1 = arith.constant 22.6274166 : f32
    %5 = vector.broadcast %cst_1 : f32 to vector<2x1xf32>
    %6 = arith.mulf %5, %4 : vector<2x1xf32>
    %c0_2 = arith.constant 0 : index
    %c0_3 = arith.constant 0 : index
    %7 = vector.load %arg1[%c0_2, %c0_3] : memref<2x1024xf32, #tpu.memory_space<vmem>>, vector<2x1024xf32>
    %8 = vector.broadcast %6 : vector<2x1xf32> to vector<2x1024xf32>
    %9 = arith.mulf %7, %8 : vector<2x1024xf32>
    %c0_4 = arith.constant 0 : index
    %c0_5 = arith.constant 0 : index
    %10 = vector.load %arg2[%c0_4, %c0_5] : memref<2x1024xf32, #tpu.memory_space<vmem>>, vector<2x1024xf32>
    tpu.vector_store %arg2[%c0_4, %c0_5], %9 {strides = array<i32>} : memref<2x1024xf32, #tpu.memory_space<vmem>>, vector<2x1024xf32>,
    return
  }
  func.func @transform_0(%arg0: i32) -> (i32, i32) {
    %c0_i32 = arith.constant 0 : i32
    %c0_i32_0 = arith.constant 0 : i32
    return %arg0, %c0_i32 : i32, i32
  }
  func.func @transform_1(%arg0: i32) -> (i32, i32) {
    %c0_i32 = arith.constant 0 : i32
    %c0_i32_0 = arith.constant 0 : i32
    return %arg0, %c0_i32 : i32, i32
  }
}

</mosaic_0001>

<bundles_post_ra>
// kernel: tpu_custom_call.1
= control target key start
LH: loop header
LB: loop body
LE: loop exit
PB: predicated region body
PF: predicated region fallthrough
CT: control target
= control target key end

     0   :  { %6 = vsyncpa [#allocation3], 0  ;;  %s217_s0 = inlined_call_operand.hbm [shape: f32[2,1024], index: 0, kind: input, shape index: {}]   ;;  %s218_s1 = inlined_call_operand.hbm [shape: f32[2,1024], index: 1, kind: output, shape index: {}]  }
   0x1   :  { %7 = vsyncpa [#allocation4], 0  ;;  %s171_s6 = smov [#allocation2]   ;;  %s123_s10 = scalar_lea.hbm %s217_s0, 256 }
   0x2   :  { %s14_s7 = sshll.u32 %s171_s6, 4  ;;  %p124_p0 = scmp.ne.s32.totalorder %s217_s0, %s123_s10  ;;  %s15_s7 = int_to_ptr.vmem [resolvable:$true] %s14_s7 }
   0x3   :  { %p127_p1 = scmp.lt.u32.totalorder %s123_s10, %s217_s0 }
   0x5   :  { %p129_p2 = pnand %p127_p1, %p124_p0 }
   0x7   :  { %132 = shalt.err (!%p129_p2)
}
   0x8   :  { %s133_s15 = scalar_lea.vmem %s15_s7, 256  ;;  %p138_p4 = scmp.lt.s32.totalorder %s15_s7, %s15_s7 }
   0x9   :  { %p134_p3 = scmp.ne.s32.totalorder %s15_s7, %s133_s15  ;;  %p139_p5 = scmp.lt.s32.totalorder %s133_s15, %s133_s15 }
   0xb   :  { %p140_p6 = por %p139_p5, %p138_p4 }
   0xd   :  { %p141_p7 = pnand %p140_p6, %p134_p3 }
   0xf   :  { %144 = shalt.err (!%p141_p7)
}
  0x10   :  { %17 = dma.hbm_to_vmem [thread:$0]  %s217_s0, 256, %s15_s7, [#allocation3]  }
  0x11   :  { %167 = dma.done.wait [#allocation3], 256  }
  0x12   :  { %168 = vsyncadd [#allocation3], 4294967040  ;;  %v31_v0 = vlaneseq  ;;  %v172_v1 = vmov 1983009808   ;;  %v21_v6 = vld [vmem:[#allocation2] sm:$0xff]  ;;  %v22_v7 = vld [vmem:[#allocation2 + $0x8] sm:$0xff] }
  0x13   :  { %v29_v2 = vunpack.c.l.s4 %v172_v1  ;;  %v23_v8 = vmul.f32 %v21_v6, %v21_v6  ;;  %v24_v9 = vmul.f32 %v22_v7, %v22_v7  ;;  %vm69_vm0 = vcmask 1041408   ;;  %s174_s0 = smov [#allocation5]  }
  0x14   :  { %v32_v3 = vshrl.u32 %v31_v0, 7  ;;  %v173_v36 = vmov 269488144   ;;  %s108_s18 = sshll.u32 %s174_s0, 4  ;;  %s109_s18 = int_to_ptr.vmem [resolvable:$true] %s108_s18 }
  0x15   :  { %v30_v4 = vunpack.c.0.s8 %v29_v2  ;;  %v27_v10 = vcombine.high %v23_v8, %v23_v8  ;;  %v44_v14 = vcombine.high %v24_v9, %v24_v9  ;;  %v91_v37 = vunpack.c.l.s4 %v173_v36  ;;  %s145_s19 = scalar_lea.vmem %s109_s18, 256  ;;  %p150_p9 = scmp.lt.s32.totalorder %s109_s18, %s109_s18 }
  0x16   :  { %p146_p8 = scmp.ne.s32.totalorder %s109_s18, %s145_s19  ;;  %p151_p10 = scmp.lt.s32.totalorder %s145_s19, %s145_s19 }
  0x17   :  { %v33_v5 = vsub.s32 %v30_v4, %v32_v3  ;;  %v92_v38 = vunpack.c.0.s8 %v91_v37 }
  0x18   :  { %p152_p11 = por %p151_p10, %p150_p9 }
  0x19   :  { %v34_v11 = vrot.slane %v23_v8, %v33_v5  ;;  %v41_v12 = vrot.slane %v27_v10, %v33_v5  ;;  %v51_v15 = vrot.slane %v24_v9, %v33_v5  ;;  %v58_v21 = vrot.slane %v44_v14, %v33_v5 }
  0x1a   :  { %v95_v39 = vsub.s32 %v92_v38, %v32_v3  ;;  %p153_p12 = pnand %p152_p11, %p146_p8 }
  0x1b   :  { %v42_v13 = vcombine.high %v34_v11, %v34_v11  ;;  %v70_v16 = vsel %vm69_vm0, %v34_v11, 0.0  ;;  %v43_v17 = vcombine.high %v41_v12, %v41_v12  ;;  %v73_v19 = vsel %vm69_vm0, %v41_v12, 0.0 }
  0x1c   :  { %v59_v22 = vcombine.high %v51_v15, %v51_v15  ;;  %v77_v25 = vsel %vm69_vm0, %v51_v15, 0.0  ;;  %v60_v27 = vcombine.high %v58_v21, %v58_v21  ;;  %v81_v30 = vsel %vm69_vm0, %v58_v21, 0.0 }
  0x1d   :  { %v71_v18 = vsel %vm69_vm0, %v42_v13, 0.0  ;;  %v75_v23 = vsel %vm69_vm0, %v43_v17, 0.0 }
  0x1e   :  { %v72_v20 = vadd.f32 %v71_v18, %v70_v16  ;;  %v79_v28 = vsel %vm69_vm0, %v59_v22, 0.0  ;;  %v83_v32 = vsel %vm69_vm0, %v60_v27, 0.0 }
  0x20   :  { %v74_v24 = vadd.f32 %v73_v19, %v72_v20 }
  0x22   :  { %v76_v26 = vadd.f32 %v75_v23, %v74_v24 }
  0x24   :  { %v78_v29 = vadd.f32 %v77_v25, %v76_v26 }
  0x26   :  { %v80_v31 = vadd.f32 %v79_v28, %v78_v29 }
  0x28   :  { %v82_v33 = vadd.f32 %v81_v30, %v80_v31 }
  0x2a   :  { %v84_v34 = vadd.f32 %v83_v32, %v82_v33 }
  0x2c   :  { %85 = vadd.xlane.f32.xlu0 %v84_v34 }
  0xb9   :  { %v86_v35 = vpop.xlane.xlu0 %85 }
  0xba   :  { %121 = vrsqrt.f32 %v86_v35 }
  0xc4   :  { %v122_v40 = vpop.eup %121 }
  0xc5   :  { %v88_v41 = vmul.f32 22.627417, %v122_v40 }
  0xc7   :  { %v96_v42 = vrot.slane %v88_v41, %v95_v39 }
  0xc9   :  { %v98_v43 = vmul.f32 %v96_v42, %v21_v6  ;;  %v99_v44 = vmul.f32 %v96_v42, %v22_v7 }
  0xcb   :  { %100 = vst [vmem:[#allocation5] sm:$0xff] %v98_v43  ;;  %101 = vst [vmem:[#allocation5 + $0x8] sm:$0xff] %v99_v44 }
  0xcc   :  { %156 = shalt.err (!%p153_p12)
}
  0xcd   :  { %s157_s22 = scalar_lea.hbm %s218_s1, 256 }
  0xce   :  { %p158_p13 = scmp.ne.s32.totalorder %s218_s1, %s157_s22  ;;  %p161_p0 = scmp.lt.u32.totalorder %s157_s22, %s218_s1 }
  0xd0   :  { %p163_p1 = pnand %p161_p0, %p158_p13 }
  0xd2   :  { %166 = shalt.err (!%p163_p1)
}
  0xd3   :  { %111 = dma.vmem_to_hbm [thread:$0]  %s109_s18, 256, %s218_s1, [#allocation4]  }
  0xd4   :  { %169 = dma.done.wait [#allocation4], 256  }
  0xd5   :  { %170 = vsyncadd [#allocation4], 4294967040 }
  0xd6   :  { %115 = vsyncpa [#allocation3], 1 }
  0xd7   :  { %116 = vsyncpa [#allocation4], 1 }

</bundles_post_ra>
